<compile_context>
chip_gen: v7x
topology: tpu7x:2x2x1
jax: 0.10.0
libtpu: 0.0.40
codegen_flags: <defaults>
</compile_context>

<pallas_src>
import functools

import jax
import jax.numpy as jnp
from jax.experimental import pallas as pl
from jax.experimental.pallas import tpu as pltpu

_LANE = 128
_SUBLANE = 8
_MASK_VALUE = -1e30
_MiB = 1024 * 1024


def _round_up(x, m):
    return ((x + m - 1) // m) * m


def _vmem_capacity_bytes():
    # Per-TensorCore VMEM: 128 MiB on v5e/v6e, 64 MiB on v7x.
    try:
        cap = int(pltpu.get_tpu_info().vmem_capacity_bytes)
    except Exception:
        cap = 64 * _MiB  # conservative default (v7x per-core)
    return max(cap, 32 * _MiB)


def _attention_kernel(q_ref, k_ref, v_ref, out_ref, *attn_refs,
                      no_valid, no_pad, mxu_bf16):
    # q_ref: [1, TQ, Dp], k_ref: [1, Nop, Dp], v_ref: [1, Nop, Dvp]
    q = q_ref[0]
    k = k_ref[0]
    v = v_ref[0]

    # scores = Q @ K^T: contract last dims on the MXU (no explicit K transpose).
    scores = jax.lax.dot_general(
        q, k,
        dimension_numbers=(((1,), (1,)), ((), ())),
        preferred_element_type=jnp.float32,
    )  # [TQ, Nop] f32

    # Mask padded key columns (static check: only emitted when padding exists).
    if no_valid != no_pad:
        col = jax.lax.broadcasted_iota(jnp.int32, scores.shape, 1)
        scores = jnp.where(col < no_valid, scores, _MASK_VALUE)

    # Softmax over the object axis, kept in f32 (VPU + EUP).  The per-row
    # reciprocal is exact ([TQ, 1] only) so the stored attention map is
    # exactly normalized.
    m = jnp.max(scores, axis=-1, keepdims=True)
    e = jnp.exp(scores - m)
    denom = jnp.sum(e, axis=-1, keepdims=True)
    w = e * (1.0 / denom)

    if attn_refs:
        attn_refs[0][0] = w.astype(attn_refs[0].dtype)

    p = w.astype(jnp.bfloat16) if mxu_bf16 else w.astype(v.dtype)
    out_ref[0] = jnp.dot(
        p, v, preferred_element_type=jnp.float32
    ).astype(out_ref.dtype)


def attention(queries, keys, values, *, mxu_bf16=True,
              return_attention_map=True, attn_map_dtype=None,
              vmem_budget_bytes=None):
    """Dot-product attention.

    Returns (result [B, Nq, Dv], attention_map [B, Nq, No]) when
    return_attention_map=True, otherwise (result, None).
    """
    B, Nq, Dq = queries.shape
    Bk, No, Dk = keys.shape
    Bv, Nov, Dv = values.shape
    assert B == Bk == Bv and No == Nov and Dq == Dk

    out_dtype = queries.dtype
    attn_dtype = out_dtype if attn_map_dtype is None else jnp.dtype(attn_map_dtype)
    compute_dtype = jnp.bfloat16 if mxu_bf16 else queries.dtype
    in_item = jnp.dtype(compute_dtype).itemsize
    out_item = jnp.dtype(out_dtype).itemsize
    attn_item = jnp.dtype(attn_dtype).itemsize

    # Pad feature / object dims to lane-dense (128) widths; Nq to the q-tile.
    d_pad = _round_up(Dq, _LANE)
    dv_pad = _round_up(Dv, _LANE)
    no_pad = _round_up(No, _LANE)

    phys_vmem = _vmem_capacity_bytes()
    if vmem_budget_bytes is None:
        # ~45% of per-core VMEM for the pipeline working set:
        # ~28 MiB on v7x (64 MiB), ~57 MiB on v5e/v6e (128 MiB).
        vmem_budget_bytes = max(16 * _MiB, int(phys_vmem * 0.45))

    def vmem_est(tq):
        # K/V are resident and single-buffered -> counted once.
        kv = no_pad * (d_pad + dv_pad) * in_item
        # Q / out / attn tiles are double-buffered by the pipeline.
        q_t = tq * d_pad * in_item
        o_t = tq * dv_pad * out_item
        a_t = (tq * no_pad * attn_item) if return_attention_map else 0
        # In-kernel f32 softmax temporaries (scores / e / w live set).
        temps = 2 * tq * no_pad * 4
        return kv + 2 * (q_t + o_t + a_t) + temps + 2 * _MiB

    nq8 = _round_up(Nq, _SUBLANE)
    tq = _SUBLANE
    for cand in (512, 256, 128, 64, 32, 16, 8):
        if cand <= nq8 and vmem_est(cand) <= vmem_budget_bytes:
            tq = cand
            break
    nq_pad = _round_up(Nq, tq)

    def prep(x, n_to, d_to):
        n, d = x.shape[1], x.shape[2]
        if mxu_bf16 and x.dtype != jnp.bfloat16:
            x = x.astype(jnp.bfloat16)  # fused with the pad; halves DMA bytes
        if n_to != n or d_to != d:
            x = jnp.pad(x, ((0, 0), (0, n_to - n), (0, d_to - d)))
        return x

    qp = prep(queries, nq_pad, d_pad)
    kp = prep(keys, no_pad, d_pad)
    vp = prep(values, no_pad, dv_pad)

    kernel = functools.partial(
        _attention_kernel, no_valid=No, no_pad=no_pad, mxu_bf16=mxu_bf16)

    out_shapes = [jax.ShapeDtypeStruct((B, nq_pad, dv_pad), out_dtype)]
    out_specs = [pl.BlockSpec((1, tq, dv_pad), lambda b, i: (b, i, 0))]
    if return_attention_map:
        out_shapes.append(jax.ShapeDtypeStruct((B, nq_pad, no_pad), attn_dtype))
        out_specs.append(pl.BlockSpec((1, tq, no_pad), lambda b, i: (b, i, 0)))

    # Shard the batch axis across TensorCores (v7x) so each core keeps its own
    # K/V resident; when B == 1 shard the q-tile axis instead.
    if B > 1:
        dims = ("parallel", "arbitrary")
    else:
        dims = ("arbitrary", "parallel")

    vmem_cap = min(int(phys_vmem * 0.85), 100 * _MiB)
    vmem_limit = int(min(max(2 * vmem_est(tq), 16 * _MiB), vmem_cap))

    def run(single_buffer_kv):
        kv_kwargs = {"pipeline_mode": pl.Buffered(1)} if single_buffer_kv else {}
        grid_spec = pltpu.PrefetchScalarGridSpec(
            num_scalar_prefetch=0,
            grid=(B, nq_pad // tq),
            in_specs=[
                pl.BlockSpec((1, tq, d_pad), lambda b, i: (b, i, 0)),
                # K/V block index depends only on the batch index -> resident
                # in VMEM across the q-tile axis (no per-q-step re-DMA).
                pl.BlockSpec((1, no_pad, d_pad), lambda b, i: (b, 0, 0),
                             **kv_kwargs),
                pl.BlockSpec((1, no_pad, dv_pad), lambda b, i: (b, 0, 0),
                             **kv_kwargs),
            ],
            out_specs=out_specs,
        )
        return pl.pallas_call(
            kernel,
            out_shape=tuple(out_shapes),
            grid_spec=grid_spec,
            compiler_params=pltpu.CompilerParams(
                dimension_semantics=dims,
                vmem_limit_bytes=vmem_limit,
            ),
        )(qp, kp, vp)

    try:
        outs = run(single_buffer_kv=True)
    except Exception:
        # Fallback if this Pallas version rejects Buffered(1) on revisited
        # blocks; default double-buffering is correct, just uses more VMEM.
        outs = run(single_buffer_kv=False)

    if return_attention_map:
        out_pad, attn_pad = outs
    else:
        out_pad = outs[0] if isinstance(outs, (tuple, list)) else outs
        attn_pad = None

    result = out_pad
    if nq_pad != Nq or dv_pad != Dv:
        result = result[:, :Nq, :Dv]

    attention_map = None
    if return_attention_map:
        attention_map = attn_pad
        if nq_pad != Nq or no_pad != No:
            attention_map = attention_map[:, :Nq, :No]

    return result, attention_map


def _reference(queries, keys, values):
    hp = jax.lax.Precision.HIGHEST
    scores = jnp.einsum("bqd,bkd->bqk", queries, keys, precision=hp)
    weights = jax.nn.softmax(scores, axis=2)
    result = jnp.einsum("bqk,bkd->bqd", weights, values, precision=hp)
    return result, weights


if __name__ == "__main__":
    B, Nq, No, D, Dv = 2, 8, 16, 32, 32
    key = jax.random.PRNGKey(0)
    kq, kk, kv = jax.random.split(key, 3)
    queries = jax.random.normal(kq, (B, Nq, D), dtype=jnp.float32)
    keys = jax.random.normal(kk, (B, No, D), dtype=jnp.float32)
    values = jax.random.normal(kv, (B, No, Dv), dtype=jnp.float32)

    ref_result, ref_weights = _reference(queries, keys, values)

    # Default path: bf16 MXU inputs with f32 accumulation (native MXU rate,
    # halved HBM traffic).  Tolerances sized for bf16 input rounding.
    result, attention_map = attention(queries, keys, values)
    jax.block_until_ready((result, attention_map))
    assert jnp.allclose(result, ref_result, atol=5e-2, rtol=5e-2)
    assert jnp.allclose(attention_map, ref_weights, atol=5e-2, rtol=5e-2)

    # Exact-f32 path (multi-pass MXU) for accuracy-critical callers.
    result32, attn32 = attention(queries, keys, values, mxu_bf16=False)
    jax.block_until_ready((result32, attn32))
    assert jnp.allclose(result32, ref_result, atol=2e-3, rtol=2e-3)
    assert jnp.allclose(attn32, ref_weights, atol=2e-3, rtol=2e-3)

    print("KERNEL_OK")
</pallas_src>

<mosaic_0001>
module attributes {stable_mosaic.version = 11 : i64} {
  func.func @_attention_kernel(%arg0: i32, %arg1: i32, %arg2: memref<1x8x128xbf16, #tpu.memory_space<vmem>>, %arg3: memref<1x128x128xbf16, #tpu.memory_space<vmem>>, %arg4: memref<1x128x128xbf16, #tpu.memory_space<vmem>>, %arg5: memref<1x8x128xf32, #tpu.memory_space<vmem>>, %arg6: memref<1x8x128xf32, #tpu.memory_space<vmem>>) attributes {dimension_semantics = [#tpu.dimension_semantics<parallel>, #tpu.dimension_semantics<arbitrary>], iteration_bounds = array<i64: 2, 1>, scalar_prefetch = 0 : i64, scratch_operands = 0 : i64, tpu.core_type = #tpu.core_type<tc>, window_params = [{transform_indices = @transform_0, window_bounds = array<i64: 1, 8, 128>}, {pipeline_mode = #tpu.pipeline_mode<synchronous>, transform_indices = @transform_1, window_bounds = array<i64: 1, 128, 128>}, {pipeline_mode = #tpu.pipeline_mode<synchronous>, transform_indices = @transform_2, window_bounds = array<i64: 1, 128, 128>}, {transform_indices = @transform_3, window_bounds = array<i64: 1, 8, 128>}, {transform_indices = @transform_4, window_bounds = array<i64: 1, 8, 128>}]} {
    %c0 = arith.constant 0 : index
    %c0_0 = arith.constant 0 : index
    %c0_1 = arith.constant 0 : index
    %0 = vector.load %arg2[%c0, %c0_0, %c0_1] : memref<1x8x128xbf16, #tpu.memory_space<vmem>>, vector<1x8x128xbf16>
    %1 = vector.shape_cast %0 : vector<1x8x128xbf16> to vector<8x128xbf16>
    %c0_2 = arith.constant 0 : index
    %c0_3 = arith.constant 0 : index
    %c0_4 = arith.constant 0 : index
    %2 = vector.load %arg3[%c0_2, %c0_3, %c0_4] : memref<1x128x128xbf16, #tpu.memory_space<vmem>>, vector<1x128x128xbf16>
    %3 = vector.shape_cast %2 : vector<1x128x128xbf16> to vector<128x128xbf16>
    %c0_5 = arith.constant 0 : index
    %c0_6 = arith.constant 0 : index
    %c0_7 = arith.constant 0 : index
    %4 = vector.load %arg4[%c0_5, %c0_6, %c0_7] : memref<1x128x128xbf16, #tpu.memory_space<vmem>>, vector<1x128x128xbf16>
    %5 = vector.shape_cast %4 : vector<1x128x128xbf16> to vector<128x128xbf16>
    %cst = arith.constant dense<0.000000e+00> : vector<8x128xf32>
    %6 = tpu.matmul %1, %3, %cst {dimension_numbers = #tpu.dot_dimension_numbers<[1], [1], [0], [0], [0, 0, 1, 0], [], []>} : vector<8x128xbf16>, vector<128x128xbf16>, vector<8x128xf32> -> vector<8x128xf32>
    %7 = tpu.iota {dimensions = array<i32: 1>} : vector<8x128xi32>
    %c16_i32 = arith.constant 16 : i32
    %8 = vector.broadcast %c16_i32 : i32 to vector<8x128xi32>
    %9 = arith.cmpi slt, %7, %8 : vector<8x128xi32>
    %cst_8 = arith.constant -1.000000e+30 : f32
    %10 = vector.broadcast %cst_8 : f32 to vector<8x128xf32>
    %11 = arith.select %9, %6, %10 : vector<8x128xi1>, vector<8x128xf32>
    %cst_9 = arith.constant dense<0xFF800000> : vector<8xf32>
    %12 = vector.multi_reduction <maximumf>, %11, %cst_9 [1] : vector<8x128xf32> to vector<8xf32>
    %13 = vector.shape_cast %12 : vector<8xf32> to vector<8x1xf32>
    %14 = vector.broadcast %13 : vector<8x1xf32> to vector<8x128xf32>
    %15 = arith.subf %11, %14 : vector<8x128xf32>
    %16 = math.exp %15 : vector<8x128xf32>
    %cst_10 = arith.constant dense<0.000000e+00> : vector<8xf32>
    %17 = vector.multi_reduction <add>, %16, %cst_10 [1] : vector<8x128xf32> to vector<8xf32>
    %18 = vector.shape_cast %17 : vector<8xf32> to vector<8x1xf32>
    %cst_11 = arith.constant 1.000000e+00 : f32
    %19 = vector.broadcast %cst_11 : f32 to vector<8x1xf32>
    %20 = arith.divf %19, %18 : vector<8x1xf32>
    %21 = vector.broadcast %20 : vector<8x1xf32> to vector<8x128xf32>
    %22 = arith.mulf %16, %21 : vector<8x128xf32>
    %c0_12 = arith.constant 0 : index
    %c0_13 = arith.constant 0 : index
    %c0_14 = arith.constant 0 : index
    %23 = vector.load %arg6[%c0_12, %c0_13, %c0_14] : memref<1x8x128xf32, #tpu.memory_space<vmem>>, vector<1x8x128xf32>
    %24 = vector.shape_cast %23 : vector<1x8x128xf32> to vector<8x128xf32>
    %25 = vector.shape_cast %22 : vector<8x128xf32> to vector<1x8x128xf32>
    tpu.vector_store %arg6[%c0_12, %c0_13, %c0_14], %25 {strides = array<i32>} : memref<1x8x128xf32, #tpu.memory_space<vmem>>, vector<1x8x128xf32>,
    %26 = arith.truncf %22 : vector<8x128xf32> to vector<8x128xbf16>
    %cst_15 = arith.constant dense<0.000000e+00> : vector<8x128xf32>
    %27 = tpu.matmul %26, %5, %cst_15 {dimension_numbers = #tpu.dot_dimension_numbers<[1], [0], [0], [1], [0, 0, 1, 1], [], []>} : vector<8x128xbf16>, vector<128x128xbf16>, vector<8x128xf32> -> vector<8x128xf32>
    %c0_16 = arith.constant 0 : index
    %c0_17 = arith.constant 0 : index
    %c0_18 = arith.constant 0 : index
    %28 = vector.load %arg5[%c0_16, %c0_17, %c0_18] : memref<1x8x128xf32, #tpu.memory_space<vmem>>, vector<1x8x128xf32>
    %29 = vector.shape_cast %28 : vector<1x8x128xf32> to vector<8x128xf32>
    %30 = vector.shape_cast %27 : vector<8x128xf32> to vector<1x8x128xf32>
    tpu.vector_store %arg5[%c0_16, %c0_17, %c0_18], %30 {strides = array<i32>} : memref<1x8x128xf32, #tpu.memory_space<vmem>>, vector<1x8x128xf32>,
    return
  }
  func.func @transform_0(%arg0: i32, %arg1: i32) -> (i32, i32, i32) {
    %c0_i32 = arith.constant 0 : i32
    %c0_i32_0 = arith.constant 0 : i32
    return %arg0, %arg1, %c0_i32 : i32, i32, i32
  }
  func.func @transform_1(%arg0: i32, %arg1: i32) -> (i32, i32, i32) {
    %c0_i32 = arith.constant 0 : i32
    %c0_i32_0 = arith.constant 0 : i32
    %c0_i32_1 = arith.constant 0 : i32
    return %arg0, %c0_i32, %c0_i32_0 : i32, i32, i32
  }
  func.func @transform_2(%arg0: i32, %arg1: i32) -> (i32, i32, i32) {
    %c0_i32 = arith.constant 0 : i32
    %c0_i32_0 = arith.constant 0 : i32
    %c0_i32_1 = arith.constant 0 : i32
    return %arg0, %c0_i32, %c0_i32_0 : i32, i32, i32
  }
  func.func @transform_3(%arg0: i32, %arg1: i32) -> (i32, i32, i32) {
    %c0_i32 = arith.constant 0 : i32
    %c0_i32_0 = arith.constant 0 : i32
    return %arg0, %arg1, %c0_i32 : i32, i32, i32
  }
  func.func @transform_4(%arg0: i32, %arg1: i32) -> (i32, i32, i32) {
    %c0_i32 = arith.constant 0 : i32
    %c0_i32_0 = arith.constant 0 : i32
    return %arg0, %arg1, %c0_i32 : i32, i32, i32
  }
}

module attributes {stable_mosaic.version = 11 : i64} {
  func.func @_attention_kernel(%arg0: i32, %arg1: i32, %arg2: memref<1x8x128xbf16, #tpu.memory_space<vmem>>, %arg3: memref<1x128x128xbf16, #tpu.memory_space<vmem>>, %arg4: memref<1x128x128xbf16, #tpu.memory_space<vmem>>, %arg5: memref<1x8x128xf32, #tpu.memory_space<vmem>>, %arg6: memref<1x8x128xf32, #tpu.memory_space<vmem>>) attributes {dimension_semantics = [#tpu.dimension_semantics<parallel>, #tpu.dimension_semantics<arbitrary>], iteration_bounds = array<i64: 2, 1>, scalar_prefetch = 0 : i64, scratch_operands = 0 : i64, tpu.core_type = #tpu.core_type<tc>, window_params = [{transform_indices = @transform_0, window_bounds = array<i64: 1, 8, 128>}, {transform_indices = @transform_1, window_bounds = array<i64: 1, 128, 128>}, {transform_indices = @transform_2, window_bounds = array<i64: 1, 128, 128>}, {transform_indices = @transform_3, window_bounds = array<i64: 1, 8, 128>}, {transform_indices = @transform_4, window_bounds = array<i64: 1, 8, 128>}]} {
    %c0 = arith.constant 0 : index
    %c0_0 = arith.constant 0 : index
    %c0_1 = arith.constant 0 : index
    %0 = vector.load %arg2[%c0, %c0_0, %c0_1] : memref<1x8x128xbf16, #tpu.memory_space<vmem>>, vector<1x8x128xbf16>
    %1 = vector.shape_cast %0 : vector<1x8x128xbf16> to vector<8x128xbf16>
    %c0_2 = arith.constant 0 : index
    %c0_3 = arith.constant 0 : index
    %c0_4 = arith.constant 0 : index
    %2 = vector.load %arg3[%c0_2, %c0_3, %c0_4] : memref<1x128x128xbf16, #tpu.memory_space<vmem>>, vector<1x128x128xbf16>
    %3 = vector.shape_cast %2 : vector<1x128x128xbf16> to vector<128x128xbf16>
    %c0_5 = arith.constant 0 : index
    %c0_6 = arith.constant 0 : index
    %c0_7 = arith.constant 0 : index
    %4 = vector.load %arg4[%c0_5, %c0_6, %c0_7] : memref<1x128x128xbf16, #tpu.memory_space<vmem>>, vector<1x128x128xbf16>
    %5 = vector.shape_cast %4 : vector<1x128x128xbf16> to vector<128x128xbf16>
    %cst = arith.constant dense<0.000000e+00> : vector<8x128xf32>
    %6 = tpu.matmul %1, %3, %cst {dimension_numbers = #tpu.dot_dimension_numbers<[1], [1], [0], [0], [0, 0, 1, 0], [], []>} : vector<8x128xbf16>, vector<128x128xbf16>, vector<8x128xf32> -> vector<8x128xf32>
    %7 = tpu.iota {dimensions = array<i32: 1>} : vector<8x128xi32>
    %c16_i32 = arith.constant 16 : i32
    %8 = vector.broadcast %c16_i32 : i32 to vector<8x128xi32>
    %9 = arith.cmpi slt, %7, %8 : vector<8x128xi32>
    %cst_8 = arith.constant -1.000000e+30 : f32
    %10 = vector.broadcast %cst_8 : f32 to vector<8x128xf32>
    %11 = arith.select %9, %6, %10 : vector<8x128xi1>, vector<8x128xf32>
    %cst_9 = arith.constant dense<0xFF800000> : vector<8xf32>
    %12 = vector.multi_reduction <maximumf>, %11, %cst_9 [1] : vector<8x128xf32> to vector<8xf32>
    %13 = vector.shape_cast %12 : vector<8xf32> to vector<8x1xf32>
    %14 = vector.broadcast %13 : vector<8x1xf32> to vector<8x128xf32>
    %15 = arith.subf %11, %14 : vector<8x128xf32>
    %16 = math.exp %15 : vector<8x128xf32>
    %cst_10 = arith.constant dense<0.000000e+00> : vector<8xf32>
    %17 = vector.multi_reduction <add>, %16, %cst_10 [1] : vector<8x128xf32> to vector<8xf32>
    %18 = vector.shape_cast %17 : vector<8xf32> to vector<8x1xf32>
    %cst_11 = arith.constant 1.000000e+00 : f32
    %19 = vector.broadcast %cst_11 : f32 to vector<8x1xf32>
    %20 = arith.divf %19, %18 : vector<8x1xf32>
    %21 = vector.broadcast %20 : vector<8x1xf32> to vector<8x128xf32>
    %22 = arith.mulf %16, %21 : vector<8x128xf32>
    %c0_12 = arith.constant 0 : index
    %c0_13 = arith.constant 0 : index
    %c0_14 = arith.constant 0 : index
    %23 = vector.load %arg6[%c0_12, %c0_13, %c0_14] : memref<1x8x128xf32, #tpu.memory_space<vmem>>, vector<1x8x128xf32>
    %24 = vector.shape_cast %23 : vector<1x8x128xf32> to vector<8x128xf32>
    %25 = vector.shape_cast %22 : vector<8x128xf32> to vector<1x8x128xf32>
    tpu.vector_store %arg6[%c0_12, %c0_13, %c0_14], %25 {strides = array<i32>} : memref<1x8x128xf32, #tpu.memory_space<vmem>>, vector<1x8x128xf32>,
    %26 = arith.truncf %22 : vector<8x128xf32> to vector<8x128xbf16>
    %cst_15 = arith.constant dense<0.000000e+00> : vector<8x128xf32>
    %27 = tpu.matmul %26, %5, %cst_15 {dimension_numbers = #tpu.dot_dimension_numbers<[1], [0], [0], [1], [0, 0, 1, 1], [], []>} : vector<8x128xbf16>, vector<128x128xbf16>, vector<8x128xf32> -> vector<8x128xf32>
    %c0_16 = arith.constant 0 : index
    %c0_17 = arith.constant 0 : index
    %c0_18 = arith.constant 0 : index
    %28 = vector.load %arg5[%c0_16, %c0_17, %c0_18] : memref<1x8x128xf32, #tpu.memory_space<vmem>>, vector<1x8x128xf32>
    %29 = vector.shape_cast %28 : vector<1x8x128xf32> to vector<8x128xf32>
    %30 = vector.shape_cast %27 : vector<8x128xf32> to vector<1x8x128xf32>
    tpu.vector_store %arg5[%c0_16, %c0_17, %c0_18], %30 {strides = array<i32>} : memref<1x8x128xf32, #tpu.memory_space<vmem>>, vector<1x8x128xf32>,
    return
  }
  func.func @transform_0(%arg0: i32, %arg1: i32) -> (i32, i32, i32) {
    %c0_i32 = arith.constant 0 : i32
    %c0_i32_0 = arith.constant 0 : i32
    return %arg0, %arg1, %c0_i32 : i32, i32, i32
  }
  func.func @transform_1(%arg0: i32, %arg1: i32) -> (i32, i32, i32) {
    %c0_i32 = arith.constant 0 : i32
    %c0_i32_0 = arith.constant 0 : i32
    %c0_i32_1 = arith.constant 0 : i32
    return %arg0, %c0_i32, %c0_i32_0 : i32, i32, i32
  }
  func.func @transform_2(%arg0: i32, %arg1: i32) -> (i32, i32, i32) {
    %c0_i32 = arith.constant 0 : i32
    %c0_i32_0 = arith.constant 0 : i32
    %c0_i32_1 = arith.constant 0 : i32
    return %arg0, %c0_i32, %c0_i32_0 : i32, i32, i32
  }
  func.func @transform_3(%arg0: i32, %arg1: i32) -> (i32, i32, i32) {
    %c0_i32 = arith.constant 0 : i32
    %c0_i32_0 = arith.constant 0 : i32
    return %arg0, %arg1, %c0_i32 : i32, i32, i32
  }
  func.func @transform_4(%arg0: i32, %arg1: i32) -> (i32, i32, i32) {
    %c0_i32 = arith.constant 0 : i32
    %c0_i32_0 = arith.constant 0 : i32
    return %arg0, %arg1, %c0_i32 : i32, i32, i32
  }
}

</mosaic_0001>

<bundles_post_ra>
// kernel: tpu_custom_call.1
= control target key start
LH: loop header
LB: loop body
LE: loop exit
PB: predicated region body
PF: predicated region fallthrough
CT: control target
= control target key end

     0   :  { %10 = vsyncpa [#allocation3], 0  ;;  %s1429_s0 = inlined_call_operand.hbm [shape: bf16[2,8,128], index: 0, kind: input, shape index: {}]   ;;  %s1430_s1 = inlined_call_operand.hbm [shape: bf16[2,128,128], index: 1, kind: input, shape index: {}]   ;;  %s1431_s2 = inlined_call_operand.hbm [shape: bf16[2,128,128], index: 2, kind: input, shape index: {}]   ;;  %s1432_s3 = inlined_call_operand.hbm [shape: f32[2,8,128], index: 3, kind: output, shape index: {0}]   ;;  %s1433_s4 = inlined_call_operand.hbm [shape: f32[2,8,128], index: 4, kind: output, shape index: {1}]  }
   0x1   :  { %12 = vsyncpa [#allocation3 + $0x1], 0 }
   0x2   :  { %13 = vsyncpa [#allocation6], 0 }
   0x3   :  { %14 = vsyncpa [#allocation4], 0 }
   0x4   :  { %16 = vsyncpa [#allocation4 + $0x1], 0 }
   0x5   :  { %17 = vsyncpa [#allocation10], 0 }
   0x6   :  { %19 = vsyncpa [#allocation10 + $0x1], 0  ;;  %s1129_s15 = smov 0   ;;  %s1131_s16 = smov 0  }
   0x7   :  { %s1133_s17 = smov 0   ;;  %s1135_s18 = smov 0  }
   0x8   :  { %s1137_s19 = smov 0   ;;  %s1139_s20 = smov 0  }
   0x9 LB: > { %s685_s21 = sadd.s32 4294967295, %s1093_s20   ;;  %s686_s22 = sadd.s32 4294967294, %s1093_s20   ;;  %s1093_s20 = sphi %s1139_s20, %s25_s20   ;;  %s1089_s19 = sphi %s1137_s19, %s1451_s19   ;;  %s1085_s18 = sphi %s1135_s18, %s1450_s18   ;;  %s1081_s17 = sphi %s1133_s17, %s1449_s17   ;;  %s1077_s16 = sphi %s1131_s16, %s1448_s16   ;;  %s1073_s15 = sphi %s1129_s15, %s1447_s15  }
   0xa   : > { %p59_p0 = scmp.ne.s32.totalorder %s1077_s16, %s1073_s15  ;;  %p60_p1 = scmp.eq.s32.totalorder %s685_s21, 0 }
   0xb   : > { %p143_p2 = scmp.eq.s32.totalorder %s686_s22, 1  ;;  %p687_p3 = scmp.ge.s32.totalorder %s1093_s20, 1 }
   0xc   : > { %p1166_p4 = por %p60_p1, %p59_p0  ;;  %p178_p5 = scmp.lt.s32.totalorder %s1093_s20, 3 }
   0xd   : > { %p1171_p6 = por %p143_p2, %p59_p0  ;;  %s721_s25 = sshll.u32 %s1085_s18, 10 }
   0xe   : > { %s1437_s23 = scalar_select %p1166_p4, 1, 0 }
   0xf   : > { %s1438_s24 = scalar_select %p1171_p6, 1, 0 }
  0x10   : > { %p1176_p7 = pnand %p687_p3, %p178_p5  ;;  %s1183_s29 = scalar_lea.hbm %s1430_s1, %s721_s25 }
  0x11   : > { %s1095_s30 = smov [#allocation5]   ;;  %s1198_s9 = scalar_lea.hbm %s1431_s2, %s721_s25 }
  0x12   : > { %s1439_s26 = scalar_select %p1176_p7, 1, 0 }
  0x13   : > { %p791_p8 = pneg %p1176_p7  ;;  %s193_s5 = sshll.u32 %s1095_s30, 4  ;;  %s1187_s5 = int_to_ptr.vmem [resolvable:$true] %s193_s5 }
  0x14   : > { %s1096_s10 = smov [#allocation7]   ;;  %s885_s12 = scalar_lea.hbm %s1183_s29, 1024 }
  0x15   : > { %p1191_p9 = pnand %p791_p8, %p1166_p4  ;;  %s1201_s11 = sshll.u32 %s1096_s10, 4  ;;  %s210_s11 = int_to_ptr.vmem [resolvable:$true] %s1201_s11 }
  0x16   : > { %p886_p11 = scmp.ne.s32.totalorder %s1183_s29, %s885_s12  ;;  %s890_s22 = scalar_lea.hbm %s1430_s1, 2048 }
  0x17   : > { %p887_p12 = pneg %p1191_p9  ;;  %p891_p1 = scmp.lt.u32.totalorder %s1183_s29, %s1430_s1 }
  0x18   : > { %p892_p2 = scmp.lt.u32.totalorder %s890_s22, %s885_s12  ;;  %p894_p5 = scmp.lt.u32.totalorder %s885_s12, %s1183_s29 }
  0x19   : > { %p888_p13 = pnand %p887_p12, %p886_p11 }
  0x1a   : > { %p893_p3 = por %p892_p2, %p891_p1 }
  0x1b   : > { %p889_p0 = pneg %p888_p13 }
  0x1c   : > { %p895_p8 = por %p894_p5, %p893_p3 }
  0x1e   : > { %p896_p10 = pnand %p895_p8, %p889_p0 }
  0x20   : > { %899 = shalt.err (!%p896_p10)
}
  0x21   : > { %s900_s25 = scalar_lea.vmem %s1187_s5, 1024  ;;  %p908_p4 = scmp.lt.s32.totalorder %s1187_s5, %s1187_s5 }
  0x22   : > { %p901_p11 = scmp.ne.s32.totalorder %s1187_s5, %s900_s25  ;;  %p909_p7 = scmp.lt.s32.totalorder %s900_s25, %s900_s25 }
  0x24   : > { %p903_p13 = pnand %p901_p11, %p887_p12  ;;  %p910_p1 = por %p909_p7, %p908_p4 }
  0x26   : > { %p904_p6 = pneg %p903_p13 }
  0x28   : > { %p911_p2 = pnand %p910_p1, %p904_p6 }
  0x2a   : > { %914 = shalt.err (!%p911_p2)
}
  0x2b   : > { %s1097_s30 = smov 64   ;;  %s1098_s7 = smov 4  }
  0x2c   : > { %794 = dma.hbm_to_vmem [thread:$0]  (!%p1191_p9), %s1183_s29, 1024, %s1187_s5, [#allocation6], %s1097_s30, %s1097_s30, %s1098_s7  }
  0x2d   : > { %s915_s8 = scalar_lea.hbm %s1198_s9, 1024  ;;  %s920_s13 = scalar_lea.hbm %s1431_s2, 2048 }
  0x2e   : > { %p916_p10 = scmp.ne.s32.totalorder %s1198_s9, %s915_s8  ;;  %p921_p7 = scmp.lt.u32.totalorder %s1198_s9, %s1431_s2 }
  0x2f   : > { %p922_p0 = scmp.lt.u32.totalorder %s920_s13, %s915_s8  ;;  %p924_p5 = scmp.lt.u32.totalorder %s915_s8, %s1198_s9 }
  0x30   : > { %p918_p4 = pnand %p916_p10, %p887_p12 }
  0x31   : > { %p923_p3 = por %p922_p0, %p921_p7 }
  0x32   : > { %p919_p6 = pneg %p918_p4 }
  0x33   : > { %p925_p8 = por %p924_p5, %p923_p3 }
  0x35   : > { %p926_p11 = pnand %p925_p8, %p919_p6 }
  0x37   : > { %929 = shalt.err (!%p926_p11)
}
  0x38   : > { %s930_s29 = scalar_lea.vmem %s210_s11, 1024  ;;  %p938_p10 = scmp.lt.s32.totalorder %s210_s11, %s210_s11 }
  0x39   : > { %p931_p13 = scmp.ne.s32.totalorder %s210_s11, %s930_s29  ;;  %p939_p4 = scmp.lt.s32.totalorder %s930_s29, %s930_s29 }
  0x3b   : > { %p933_p1 = pnand %p931_p13, %p887_p12  ;;  %p940_p0 = por %p939_p4, %p938_p10 }
  0x3d   : > { %p934_p2 = pneg %p933_p1 }
  0x3f   : > { %p941_p7 = pnand %p940_p0, %p934_p2 }
  0x41   : > { %944 = shalt.err (!%p941_p7)
}
  0x42   : > { %797 = dma.hbm_to_vmem [thread:$0]  (!%p1191_p9), %s1198_s9, 1024, %s210_s11, [#allocation6], %s1097_s30, %s1097_s30, %s1098_s7  }
  0x43   : > { %s46_s5 = sadd.s32 1, %s1081_s17  ;;  %s37_s27 = sadd.s32 1, %s1089_s19 }
  0x44   : > { %p53_p12 = scmp.ne.s32.totalorder %s1081_s17, %s1077_s16  ;;  %p39_p6 = scmp.ge.s32.totalorder %s37_s27, 2 }
  0x45   : > { %p54_p3 = scmp.eq.s32.totalorder %s1093_s20, 0  ;;  %p137_p5 = scmp.eq.s32.totalorder %s685_s21, 1 }
  0x46   : > { %p809_p8 = scmp.lt.s32.totalorder %s1093_s20, 2  ;;  %s1453_s27 = smov (%p39_p6, %s37_s27), 0 }
  0x47   : > { %p55_p11 = por %p54_p3, %p53_p12  ;;  %p1259_p13 = por %p137_p5, %p53_p12 }
  0x48   : > { %s41_s28 = ssub.s32 %s1089_s19, %s1453_s27  ;;  %s223_s9 = sand.u32 1, %s1081_s17  }
  0x49   : > { %p44_p9 = scmp.eq.s32.totalorder %s41_s28, 0  ;;  %s693_s11 = sshll.u32 %s223_s9, 2 }
  0x4a   : > { %s694_s25 = sshll.u32 %s1089_s19, 6  ;;  %s227_s10 = scalar_lea.vmem [#allocation2], %s693_s11 }
  0x4b   : > { %s1268_s30 = scalar_select %p44_p9, %s1081_s17, %s46_s5  }
  0x4c   : > { %s1273_s21 = scalar_lea.hbm %s1429_s0, %s694_s25  ;;  %s235_s12 = sshll.u32 %s227_s10, 4  ;;  %s1281_s12 = int_to_ptr.vmem [resolvable:$true] %s235_s12 }
  0x4d   : > { %p1277_p1 = pnand %p809_p8, %p55_p11  ;;  %s224_s14 = scalar_lea.sflag [#allocation3], %s223_s9 }
  0x4e   : > { %s945_s22 = scalar_lea.hbm %s1273_s21, 64  ;;  %s950_s28 = scalar_lea.hbm %s1429_s0, 128 }
  0x4f   : > { %p946_p2 = scmp.ne.s32.totalorder %s1273_s21, %s945_s22  ;;  %p947_p10 = pneg %p1277_p1 }
  0x50   : > { %p951_p7 = scmp.lt.u32.totalorder %s1273_s21, %s1429_s0  ;;  %p952_p12 = scmp.lt.u32.totalorder %s950_s28, %s945_s22 }
  0x51   : > { %p948_p4 = pnand %p947_p10, %p946_p2  ;;  %p954_p3 = scmp.lt.u32.totalorder %s945_s22, %s1273_s21 }
  0x52   : > { %p953_p6 = por %p952_p12, %p951_p7 }
  0x53   : > { %p949_p0 = pneg %p948_p4 }
  0x54   : > { %p955_p5 = por %p954_p3, %p953_p6 }
  0x56   : > { %p956_p8 = pnand %p955_p5, %p949_p0 }
  0x58   : > { %959 = shalt.err (!%p956_p8)
}
  0x59   : > { %s960_s9 = scalar_lea.vmem %s1281_s12, 64  ;;  %s1099_s7 = smov [#allocation2]  }
  0x5a   : > { %p961_p11 = scmp.ne.s32.totalorder %s1281_s12, %s960_s9  ;;  %s965_s8 = sshll.u32 %s1099_s7, 4  ;;  %s966_s8 = int_to_ptr.vmem [resolvable:$false] %s965_s8 }
  0x5b   : > { %s967_s10 = scalar_lea.vmem %s966_s8, 128  ;;  %p968_p4 = scmp.lt.s32.totalorder %s1281_s12, %s966_s8 }
  0x5c   : > { %p963_p9 = pnand %p961_p11, %p947_p10  ;;  %p969_p7 = scmp.lt.s32.totalorder %s967_s10, %s960_s9 }
  0x5e   : > { %p964_p2 = pneg %p963_p9  ;;  %p970_p12 = por %p969_p7, %p968_p4 }
  0x60   : > { %p971_p6 = pnand %p970_p12, %p964_p2 }
  0x62   : > { %974 = shalt.err (!%p971_p6)
}
  0x63   : > { %801 = dma.hbm_to_vmem [thread:$0]  (!%p1277_p1), %s1273_s21, 64, %s1281_s12, %s224_s14  }
  0x64   : > { %p1443_p0 = scmp.ne.s32.totalorder %s1439_s26, 0 }
  0x65   : > { %s1311_s22 = sand.u32 (!%p1443_p0), 1, %s1077_s16   ;;  %p1444_p10 = scmp.ne.s32.totalorder (!%p1443_p0), %s1437_s23, 0 }
  0x66   : > { %244 = sbr.rel (%p1443_p0) target bundleno = 932 (0x3a4), region = 32  ;;  %s696_s29 = sshll.u32 (!%p1443_p0), %s1311_s22, 2 }
  0x67   : > { %s247_s5 = scalar_lea.sflag (!%p1443_p0), [#allocation3], %s1311_s22  ;;  %s1315_s28 = scalar_lea.vmem (!%p1443_p0), [#allocation2], %s696_s29 }
  0x6d   : > { %1056 = dma.done.wait (%p1444_p10), %s247_s5, 64  }
  0x6e   : > { %1058 = vsyncadd (%p1444_p10), %s247_s5, 4294967232 }
  0x6f   : > { %1060 = dma.done.wait (%p1444_p10), [#allocation6], 2048  }
  0x70   : > { %1062 = vsyncadd (%p1444_p10), [#allocation6], 4294965248  ;;  %v1100_v0 = vmov 0.0   ;;  %vm1101_vm0 = vmmov 0   ;;  %v865_v1 = vld [vmem:[#allocation5] sm:$0xff]   ;;  %v866_v2 = vld [vmem:[#allocation5 + $0x8] sm:$0xff]   ;;  %v410_v10 = vlaneseq }
  0x71   : > { %741 = vmatprep.subr.bf16.mxu0 %v1100_v0  ;;  %757 = vmatprep.mubr.msk.bf16.mxu0 %vm1101_vm0, %v1100_v0  ;;  %v867_v3 = vld [vmem:[#allocation5 + $0x10] sm:$0xff]   ;;  %v868_v4 = vld [vmem:[#allocation5 + $0x18] sm:$0xff]   ;;  %v869_v5 = vld [vmem:[#allocation5 + $0x20] sm:$0xff]   ;;  %s697_s23 = sshll.u32 %s1311_s22, 3  ;;  %s717_s21 = sshll.u32 %s1085_s18, 7 }
  0x72   : > { %761 = vmatprep.subr.bf16.mxu1 %v1100_v0  ;;  %777 = vmatprep.mubr.msk.bf16.mxu1 %vm1101_vm0, %v1100_v0  ;;  %v870_v6 = vld [vmem:[#allocation5 + $0x28] sm:$0xff]   ;;  %v871_v7 = vld [vmem:[#allocation5 + $0x30] sm:$0xff]   ;;  %v872_v8 = vld [vmem:[#allocation5 + $0x38] sm:$0xff]   ;;  %v411_v11 = vand.u32 127, %v410_v10  ;;  %s287_s26 = scalar_lea.vmem [#allocation9], %s697_s23  ;;  %s1353_s14 = scalar_lea.hbm %s1433_s4, %s717_s21 }
  0x73   : > { %742 = vmatpush3.bf16.xpose.msra.mxu0 %v865_v1  ;;  %v289_v9 = vld [vmem:[%s1315_s28] sm:$0xf]  ;;  %v873_v17 = vld [vmem:[#allocation7] sm:$0xff]   ;;  %v874_v18 = vld [vmem:[#allocation7 + $0x8] sm:$0xff]   ;;  %s549_s11 = sshll.u32 %s287_s26, 4  ;;  %s521_s25 = scalar_lea.sflag [#allocation10], %s1311_s22  ;;  %s550_s11 = int_to_ptr.vmem [resolvable:$true] %s549_s11 }
  0x74   : > { %743 = vmatprep.subr.bf16.mxu0 %v1100_v0  ;;  %vm412_vm1 = vcmp.lt.s32.totalorder %v411_v11, 16  ;;  %762 = vmatpush3.bf16.msra.mxu1 %v873_v17  ;;  %v875_v19 = vld [vmem:[#allocation7 + $0x10] sm:$0xff]   ;;  %v876_v20 = vld [vmem:[#allocation7 + $0x18] sm:$0xff]   ;;  %v877_v25 = vld [vmem:[#allocation7 + $0x20] sm:$0xff]   ;;  %s975_s9 = scalar_lea.vmem %s550_s11, 128  ;;  %s1102_s7 = smov [#allocation9]  }
  0x75   : > { %763 = vmatprep.subr.bf16.mxu1 %v1100_v0  ;;  %v878_v26 = vld [vmem:[#allocation7 + $0x28] sm:$0xff]   ;;  %v879_v27 = vld [vmem:[#allocation7 + $0x30] sm:$0xff]   ;;  %v880_v28 = vld [vmem:[#allocation7 + $0x38] sm:$0xff]   ;;  %p976_p1 = scmp.ne.s32.totalorder %s550_s11, %s975_s9  ;;  %s979_s8 = sshll.u32 %s1102_s7, 4  ;;  %s980_s8 = int_to_ptr.vmem [resolvable:$false] %s979_s8 }
  0x76   : > { %s981_s10 = scalar_lea.vmem %s980_s8, 256  ;;  %p982_p8 = scmp.lt.s32.totalorder %s550_s11, %s980_s8 }
  0x77   : > { %p977_p3 = pnand %p976_p1, %p1259_p13  ;;  %p983_p11 = scmp.lt.s32.totalorder %s981_s10, %s975_s9 }
  0x78   : > { %764 = vmatpush3.bf16.msra.mxu1 %v874_v18 }
  0x79   : > { %765 = vmatprep.subr.bf16.mxu1 %v1100_v0  ;;  %p978_p5 = pneg %p977_p3  ;;  %p984_p9 = por %p983_p11, %p982_p8 }
  0x7b   : > { %744 = vmatpush3.bf16.xpose.msra.mxu0 %v866_v2  ;;  %p985_p2 = pnand %p984_p9, %p978_p5 }
  0x7c   : > { %745 = vmatprep.subr.bf16.mxu0 %v1100_v0  ;;  %766 = vmatpush3.bf16.msra.mxu1 %v875_v19 }
  0x7d   : > { %767 = vmatprep.subr.bf16.mxu1 %v1100_v0 }
  0x80   : > { %768 = vmatpush3.bf16.msra.mxu1 %v876_v20 }
  0x81   : > { %769 = vmatprep.subr.bf16.mxu1 %v1100_v0 }
  0x83   : > { %746 = vmatpush3.bf16.xpose.msra.mxu0 %v867_v3 }
  0x84   : > { %747 = vmatprep.subr.bf16.mxu0 %v1100_v0  ;;  %770 = vmatpush3.bf16.msra.mxu1 %v877_v25 }
  0x85   : > { %771 = vmatprep.subr.bf16.mxu1 %v1100_v0 }
  0x88   : > { %772 = vmatpush3.bf16.msra.mxu1 %v878_v26 }
  0x89   : > { %773 = vmatprep.subr.bf16.mxu1 %v1100_v0 }
  0x8b   : > { %748 = vmatpush3.bf16.xpose.msra.mxu0 %v868_v4 }
  0x8c   : > { %749 = vmatprep.subr.bf16.mxu0 %v1100_v0  ;;  %774 = vmatpush3.bf16.msra.mxu1 %v879_v27 }
  0x8d   : > { %775 = vmatprep.subr.bf16.mxu1 %v1100_v0 }
  0x90   : > { %776 = vmatpush3.bf16.msra.mxu1 %v880_v28 }
  0x93   : > { %750 = vmatpush3.bf16.xpose.msra.mxu0 %v869_v5 }
  0x94   : > { %751 = vmatprep.subr.bf16.mxu0 %v1100_v0 }
  0x9b   : > { %752 = vmatpush3.bf16.xpose.msra.mxu0 %v870_v6 }
  0x9c   : > { %753 = vmatprep.subr.bf16.mxu0 %v1100_v0 }
  0xa3   : > { %754 = vmatpush3.bf16.xpose.msra.mxu0 %v871_v7 }
  0xa4   : > { %755 = vmatprep.subr.bf16.mxu0 %v1100_v0 }
  0xab   : > { %756 = vmatpush3.bf16.xpose.msra.mxu0 %v872_v8 }
  0xb2   : > { %758 = vmatmul.mubr.bf16.vlgmr.msra.gmra.mrb[0].mxu0 %v289_v9 }
 0x185   : > { %v404_v12 = vpop.f32.mrb[0].mxu0 }
 0x186   : > { %v759_v13 = vpop.f32.mrb[1].mxu0  ;;  %v413_v14 = vsel %vm412_vm1, %v404_v12, -1e+30 }
 0x187   : > { %414 = vmax.xlane.f32.xlu0 %v413_v14  ;;  %v407_v15 = vpop.f32.mrb[2].mxu0 }
 0x188   : > { %v760_v16 = vpop.f32.mrb[3].mxu0 }
 0x214   : > { %v415_v21 = vpop.xlane.xlu0 %414 }
 0x215   : > { %v416_v22 = vsub.f32 %v413_v14, %v415_v21 }
 0x217   : > { %v417_v23 = vmul.f32 1.442695, %v416_v22 }
 0x219   : > { %881 = vpow2.f32 %v417_v23 }
 0x223   : > { %v882_v24 = vpop.eup %881 }
 0x224   : > { %419 = vadd.xlane.f32.xlu0 %v882_v24 }
 0x2b1   : > { %v420_v29 = vpop.xlane.xlu0 %419 }
 0x2b2   : > { %883 = vrcp.f32 %v420_v29 }
 0x2bc   : > { %v884_v30 = vpop.eup %883 }
 0x2bd   : > { %v423_v31 = vmul.f32 %v884_v30, %v882_v24 }
 0x2bf   : > { %v425_v32 = vpack.c.bf16 %v423_v31, %v423_v31  ;;  %424 = vst [vmem:[%s287_s26] sm:$0xff] %v423_v31 }
 0x2c1   : > { %778 = vmatmul.mubr.bf16.vlgmr.msra.gmra.mrb[0].mxu1 %v425_v32 }
 0x2c2   : > { %988 = shalt.err (!%p985_p2)
}
 0x2c3   : > { %s989_s29 = scalar_lea.hbm %s1353_s14, 128  ;;  %s993_s26 = scalar_lea.hbm %s1433_s4, 256 }
 0x2c4   : > { %p990_p4 = scmp.ne.s32.totalorder %s1353_s14, %s989_s29  ;;  %p994_p6 = scmp.lt.u32.totalorder %s1353_s14, %s1433_s4 }
 0x2c5   : > { %p995_p0 = scmp.lt.u32.totalorder %s993_s26, %s989_s29  ;;  %p997_p1 = scmp.lt.u32.totalorder %s989_s29, %s1353_s14 }
 0x2c6   : > { %p991_p7 = pnand %p990_p4, %p1259_p13 }
 0x2c7   : > { %p996_p10 = por %p995_p0, %p994_p6 }
 0x2c8   : > { %p992_p12 = pneg %p991_p7 }
 0x2c9   : > { %p998_p3 = por %p997_p1, %p996_p10 }
 0x2cb   : > { %p999_p5 = pnand %p998_p3, %p992_p12 }
 0x2cd   : > { %1002 = shalt.err (!%p999_p5)
}
 0x2ce   : > { %788 = dma.vmem_to_hbm [thread:$0]  (%p1259_p13), %s550_s11, 128, %s1353_s14, %s521_s25  }
 0x2cf   : > { %s280_s9 = scalar_lea.vmem [#allocation8], %s697_s23  ;;  %s1382_s29 = scalar_lea.hbm %s1432_s3, %s717_s21 }
 0x2d0   : > { %s535_s7 = sshll.u32 %s280_s9, 4  ;;  %s516_s5 = scalar_lea.sflag [#allocation4], %s1311_s22  ;;  %s1375_s7 = int_to_ptr.vmem [resolvable:$true] %s535_s7 }
 0x2d1   : > { %s1003_s14 = scalar_lea.vmem %s1375_s7, 128  ;;  %s1103_s23 = smov [#allocation8]  }
 0x2d2   : > { %p1004_p8 = scmp.ne.s32.totalorder %s1375_s7, %s1003_s14  ;;  %s1007_s18 = sshll.u32 %s1103_s23, 4  ;;  %s1008_s18 = int_to_ptr.vmem [resolvable:$false] %s1007_s18 }
 0x2d3   : > { %s1009_s11 = scalar_lea.vmem %s1008_s18, 256  ;;  %p1010_p2 = scmp.lt.s32.totalorder %s1375_s7, %s1008_s18 }
 0x2d4   : > { %p1005_p11 = pnand %p1004_p8, %p1259_p13  ;;  %p1011_p4 = scmp.lt.s32.totalorder %s1009_s11, %s1003_s14 }
 0x2d6   : > { %p1006_p9 = pneg %p1005_p11  ;;  %p1012_p7 = por %p1011_p4, %p1010_p2 }
 0x2d8   : > { %p1013_p12 = pnand %p1012_p7, %p1006_p9 }
 0x394   : > { %v508_v33 = vpop.f32.mrb[0].mxu1 }
 0x395   : > { %514 = vst [vmem:[%s280_s9] sm:$0xff] %v508_v33  ;;  %v779_v34 = vpop.f32.mrb[1].mxu1 }
 0x396   : > { %v511_v35 = vpop.f32.mrb[2].mxu1 }
 0x397   : > { %1016 = shalt.err (!%p1013_p12)
}
 0x398   : > { %s1017_s22 = scalar_lea.hbm %s1382_s29, 128  ;;  %s1021_s28 = scalar_lea.hbm %s1432_s3, 256 }
 0x399   : > { %p1018_p6 = scmp.ne.s32.totalorder %s1382_s29, %s1017_s22  ;;  %p1022_p1 = scmp.lt.u32.totalorder %s1382_s29, %s1432_s3 }
 0x39a   : > { %p1023_p3 = scmp.lt.u32.totalorder %s1021_s28, %s1017_s22  ;;  %p1025_p8 = scmp.lt.u32.totalorder %s1017_s22, %s1382_s29 }
 0x39b   : > { %p1019_p0 = pnand %p1018_p6, %p1259_p13 }
 0x39c   : > { %p1024_p5 = por %p1023_p3, %p1022_p1 }
 0x39d   : > { %p1020_p10 = pneg %p1019_p0 }
 0x39e   : > { %p1026_p11 = por %p1025_p8, %p1024_p5 }
 0x3a0   : > { %p1027_p9 = pnand %p1026_p11, %p1020_p10 }
 0x3a2   : > { %1030 = shalt.err (!%p1027_p9)
}
 0x3a3   : > { %787 = dma.vmem_to_hbm [thread:$0]  (%p1259_p13), %s1375_s7, 128, %s1382_s29, %s516_s5   ;;  %v780_v36 = vpop.f32.mrb[3].mxu1 }
 0x3a4 PF: > { %s561_s13 = sand.u32 1, %s1073_s15   ;;  %p1445_p2 = scmp.ne.s32.totalorder %s1438_s24, 0 }
 0x3a5   : > { %p1446_p4 = scmp.ge.s32.totalorder %s1093_s20, 2  ;;  %s562_s9 = scalar_lea.sflag [#allocation4], %s561_s13 }
 0x3a7   : > { %p803_p7 = pnand %p1446_p4, %p1445_p2 }
 0x3a9   : > { %1064 = dma.done.wait (!%p803_p7), %s562_s9, 128  }
 0x3aa   : > { %1066 = vsyncadd (!%p803_p7), %s562_s9, 4294967168  ;;  %s571_s8 = scalar_lea.sflag [#allocation10], %s561_s13 }
 0x3ab   : > { %1068 = dma.done.wait (!%p803_p7), %s571_s8, 128  }
 0x3ac   : > { %1070 = vsyncadd (!%p803_p7), %s571_s8, 4294967168  ;;  %s25_s20 = sadd.s32 1, %s1093_s20   ;;  %s1447_s15 = smov %s1077_s16 }
 0x3ad   : > { %p22_p12 = scmp.ge.s32.totalorder %s25_s20, 4   ;;  %s1448_s16 = smov %s1081_s17 }
 0x3ae   : > { %s1449_s17 = smov %s1268_s30  ;;  %s1450_s18 = smov %s1089_s19 }
 0x3af   : > { %s1451_s19 = smov %s1453_s27  ;;  %24 = sbr.rel (!%p22_p12) target bundleno = 9 (0x9), region = 104 }
 0x3b6   :  { %576 = vsyncpa [#allocation3], 1 }
 0x3b7   :  { %578 = vsyncpa [#allocation3 + $0x1], 1 }
 0x3b8   :  { %579 = vsyncpa [#allocation6], 1 }
 0x3b9   :  { %580 = vsyncpa [#allocation4], 1 }
 0x3ba   :  { %582 = vsyncpa [#allocation4 + $0x1], 1 }
 0x3bb   :  { %583 = vsyncpa [#allocation10], 1 }
 0x3bc   :  { %585 = vsyncpa [#allocation10 + $0x1], 1 }

// kernel: tpu_custom_call.1
= control target key start
LH: loop header
LB: loop body
LE: loop exit
PB: predicated region body
PF: predicated region fallthrough
CT: control target
= control target key end

     0   :  { %s1500_s0 = inlined_call_operand.hbm [shape: bf16[2,8,128], index: 0, kind: input, shape index: {}]   ;;  %s1501_s1 = inlined_call_operand.hbm [shape: bf16[2,128,128], index: 1, kind: input, shape index: {}]   ;;  %s1502_s2 = inlined_call_operand.hbm [shape: bf16[2,128,128], index: 2, kind: input, shape index: {}]   ;;  %s1503_s3 = inlined_call_operand.hbm [shape: f32[2,8,128], index: 3, kind: output, shape index: {0}]   ;;  %s1504_s4 = inlined_call_operand.hbm [shape: f32[2,8,128], index: 4, kind: output, shape index: {1}]  }
   0x1   :  { %1514 = sst [smem:[#allocation19_spill]] %s1501_s1 }
   0x2   :  { %10 = vsyncpa [#allocation3], 0 }
   0x3   :  { %12 = vsyncpa [#allocation3 + $0x1], 0 }
   0x4   :  { %13 = vsyncpa [#allocation6], 0 }
   0x5   :  { %15 = vsyncpa [#allocation6 + $0x1], 0 }
   0x6   :  { %16 = vsyncpa [#allocation4], 0 }
   0x7   :  { %18 = vsyncpa [#allocation4 + $0x1], 0 }
   0x8   :  { %19 = vsyncpa [#allocation10], 0 }
   0x9   :  { %21 = vsyncpa [#allocation10 + $0x1], 0  ;;  %s1182_s15 = smov 0   ;;  %s1184_s16 = smov 0  }
   0xa   :  { %s1186_s17 = smov 0   ;;  %s1188_s18 = smov 0  }
   0xb   :  { %s1190_s19 = smov 0   ;;  %s1192_s20 = smov 0  }
   0xc LB: > { %1515 = sst [smem:[#allocation15_spill]] %s1134_s17  ;;  %s1213_s21 = sadd.s32 4294967295, %s1146_s20   ;;  %s1146_s20 = sphi %s1192_s20, %s27_s20   ;;  %s1142_s19 = sphi %s1190_s19, %s1542_s19   ;;  %s1138_s18 = sphi %s1188_s18, %s1541_s18   ;;  %s1134_s17 = sphi %s1186_s17, %s1537_s17   ;;  %s1130_s16 = sphi %s1184_s16, %s1540_s16   ;;  %s1126_s15 = sphi %s1182_s15, %s1539_s15  }
   0xd   : > { %s738_s22 = sadd.s32 4294967294, %s1146_s20   ;;  %s39_s23 = sadd.s32 1, %s1142_s19 }
   0xe   : > { %s48_s24 = sadd.s32 1, %s1134_s17  ;;  %p41_p0 = scmp.ge.s32.totalorder %s39_s23, 2 }
   0xf   : > { %p55_p1 = scmp.ne.s32.totalorder %s1134_s17, %s1130_s16  ;;  %p56_p2 = scmp.eq.s32.totalorder %s1146_s20, 0 }
  0x10   : > { %p61_p3 = scmp.ne.s32.totalorder %s1130_s16, %s1126_s15  ;;  %s1544_s23 = smov (%p41_p0, %s39_s23), 0 }
  0x11   : > { %1516 = sst [smem:[#allocation16_spill]] %s1544_s23  ;;  %p1225_p4 = por %p56_p2, %p55_p1 }
  0x12   : > { %p62_p5 = scmp.eq.s32.totalorder %s1213_s21, 0  ;;  %s43_s26 = ssub.s32 %s1142_s19, %s1544_s23 }
  0x13   : > { %p139_p6 = scmp.eq.s32.totalorder %s1213_s21, 1  ;;  %p46_p7 = scmp.eq.s32.totalorder %s43_s26, 0 }
  0x14   : > { %p1233_p8 = por %p62_p5, %p61_p3  ;;  %p145_p10 = scmp.eq.s32.totalorder %s738_s22, 1 }
  0x15   : > { %p1237_p9 = por %p139_p6, %p55_p1  ;;  %p864_p13 = scmp.lt.s32.totalorder %s1146_s20, 2 }
  0x16   : > { %s1518_s27 = scalar_select %p1233_p8, 1, 0 }
  0x17   : > { %s1519_s28 = scalar_select %p1237_p9, 1, 0 }
  0x18   : > { %s1242_s29 = scalar_select %p46_p7, %s1134_s17, %s48_s24  }
  0x19   : > { %p1244_p11 = por %p145_p10, %p61_p3  ;;  %s1251_s5 = sand.u32 1, %s1134_s17  }
  0x1a   : > { %1520 = sst [smem:[#allocation17_spill]] %s1242_s29  ;;  %s212_s6 = sand.u32 1, %s1146_s20  }
  0x1b   : > { %s1521_s30 = scalar_select %p1244_p11, 1, 0 }
  0x1c   : > { %s1505_s7 = sshll.u32 %s1251_s5, 6  ;;  %p1257_p0 = pnand %p864_p13, %p1225_p4 }
  0x1d   : > { %1522 = sst [smem:[#allocation18_spill]] %s1521_s30  ;;  %s777_s9 = sshll.u32 %s1142_s19, 10 }
  0x1e   : > { %s1523_s8 = scalar_select %p1257_p0, 1, 0 }
  0x1f   : > { %s1524_s1 = sld [smem:[#allocation19_spill]]  ;;  %s216_s13 = scalar_lea.vmem [#allocation5], %s1505_s7 }
  0x20   : > { %s223_s14 = sshll.u32 %s216_s13, 4  ;;  %s1273_s22 = scalar_lea.sflag [#allocation6], %s212_s6  ;;  %s1271_s14 = int_to_ptr.vmem [resolvable:$true] %s223_s14 }
  0x21   : > { %p1279_p2 = pneg %p1257_p0 }
  0x25   : > { %s1267_s12 = scalar_lea.hbm %s1524_s1, %s777_s9  ;;  %s943_s11 = scalar_lea.hbm %s1524_s1, 2048 }
  0x26   : > { %s938_s24 = scalar_lea.hbm %s1267_s12, 1024  ;;  %p944_p5 = scmp.lt.u32.totalorder %s1267_s12, %s1524_s1 }
  0x27   : > { %p939_p1 = scmp.ne.s32.totalorder %s1267_s12, %s938_s24  ;;  %p945_p6 = scmp.lt.u32.totalorder %s943_s11, %s938_s24 }
  0x28   : > { %p947_p10 = scmp.lt.u32.totalorder %s938_s24, %s1267_s12 }
  0x29   : > { %p941_p3 = pnand %p1279_p2, %p939_p1  ;;  %p946_p7 = por %p945_p6, %p944_p5 }
  0x2b   : > { %p942_p4 = pneg %p941_p3  ;;  %p948_p13 = por %p947_p10, %p946_p7 }
  0x2d   : > { %p949_p12 = pnand %p948_p13, %p942_p4 }
  0x2f   : > { %952 = shalt.err (!%p949_p12)
}
  0x30   : > { %s953_s6 = scalar_lea.vmem %s1271_s14, 1024  ;;  %s1148_s26 = smov [#allocation5]  }
  0x31   : > { %p954_p1 = scmp.ne.s32.totalorder %s1271_s14, %s953_s6  ;;  %s958_s10 = sshll.u32 %s1148_s26, 4  ;;  %s959_s10 = int_to_ptr.vmem [resolvable:$false] %s958_s10 }
  0x32   : > { %s960_s7 = scalar_lea.vmem %s959_s10, 2048  ;;  %p961_p9 = scmp.lt.s32.totalorder %s1271_s14, %s959_s10 }
  0x33   : > { %p956_p3 = pnand %p954_p1, %p1279_p2  ;;  %p962_p8 = scmp.lt.s32.totalorder %s960_s7, %s953_s6 }
  0x35   : > { %p957_p11 = pneg %p956_p3  ;;  %p963_p5 = por %p962_p8, %p961_p9 }
  0x37   : > { %p964_p6 = pnand %p963_p5, %p957_p11 }
  0x39   : > { %967 = shalt.err (!%p964_p6)
}
  0x3a   : > { %s1511_s24 = smov 64   ;;  %s1150_s11 = smov 4  }
  0x3b   : > { %853 = dma.hbm_to_vmem [thread:$0]  (!%p1257_p0), %s1267_s12, 1024, %s1271_s14, %s1273_s22, %s1511_s24, %s1511_s24, %s1150_s11  }
  0x3c   : > { %s1311_s26 = scalar_lea.hbm %s1502_s2, %s777_s9  ;;  %p749_p8 = scmp.ge.s32.totalorder %s1146_s20, 1 }
  0x3d   : > { %s1526_s10 = sshll.u32 %s1251_s5, 6  ;;  %p252_p9 = scmp.lt.s32.totalorder %s1146_s20, 3 }
  0x3e   : > { %s237_s7 = scalar_lea.vmem [#allocation7], %s1526_s10  ;;  %s741_s29 = sshll.u32 %s1251_s5, 2 }
  0x3f   : > { %s244_s1 = sshll.u32 %s237_s7, 4  ;;  %p1317_p11 = pnand %p749_p8, %p252_p9  ;;  %s1328_s1 = int_to_ptr.vmem [resolvable:$true] %s244_s1 }
  0x40   : > { %s742_s17 = sshll.u32 %s1142_s19, 6  ;;  %s197_s9 = scalar_lea.vmem [#allocation2], %s741_s29 }
  0x41   : > { %s1527_s23 = scalar_select %p1317_p11, 1, 0 }
  0x42   : > { %s1326_s14 = scalar_lea.hbm %s1500_s0, %s742_s17  ;;  %s205_s13 = sshll.u32 %s197_s9, 4  ;;  %s206_s13 = int_to_ptr.vmem [resolvable:$true] %s205_s13 }
  0x43   : > { %s194_s6 = scalar_lea.sflag [#allocation3], %s1251_s5  ;;  %s968_s10 = scalar_lea.hbm %s1326_s14, 64 }
  0x44   : > { %p969_p12 = scmp.ne.s32.totalorder %s1326_s14, %s968_s10  ;;  %s973_s17 = scalar_lea.hbm %s1500_s0, 128 }
  0x45   : > { %p974_p10 = scmp.lt.u32.totalorder %s1326_s14, %s1500_s0  ;;  %p975_p13 = scmp.lt.u32.totalorder %s973_s17, %s968_s10 }
  0x46   : > { %p971_p4 = pnand %p969_p12, %p1279_p2  ;;  %p977_p3 = scmp.lt.u32.totalorder %s968_s10, %s1326_s14 }
  0x47   : > { %p976_p1 = por %p975_p13, %p974_p10 }
  0x48   : > { %p972_p7 = pneg %p971_p4 }
  0x49   : > { %p978_p5 = por %p977_p3, %p976_p1 }
  0x4b   : > { %p979_p6 = pnand %p978_p5, %p972_p7 }
  0x4d   : > { %982 = shalt.err (!%p979_p6)
}
  0x4e   : > { %s983_s29 = scalar_lea.vmem %s206_s13, 64  ;;  %s1151_s5 = smov [#allocation2]  }
  0x4f   : > { %p984_p8 = scmp.ne.s32.totalorder %s206_s13, %s983_s29  ;;  %s988_s9 = sshll.u32 %s1151_s5, 4  ;;  %s989_s9 = int_to_ptr.vmem [resolvable:$false] %s988_s9 }
  0x50   : > { %s990_s24 = scalar_lea.vmem %s989_s9, 128  ;;  %p991_p4 = scmp.lt.s32.totalorder %s206_s13, %s989_s9 }
  0x51   : > { %p986_p9 = pnand %p984_p8, %p1279_p2  ;;  %p992_p11 = scmp.lt.s32.totalorder %s990_s24, %s983_s29 }
  0x53   : > { %p987_p12 = pneg %p986_p9  ;;  %p993_p0 = por %p992_p11, %p991_p4 }
  0x55   : > { %p994_p10 = pnand %p993_p0, %p987_p12 }
  0x57   : > { %997 = shalt.err (!%p994_p10)
}
  0x58   : > { %p1528_p13 = scmp.ne.s32.totalorder %s1523_s8, 0  ;;  %s998_s10 = scalar_lea.hbm %s1311_s26, 1024 }
  0x59   : > { %p999_p7 = scmp.ne.s32.totalorder %s1311_s26, %s998_s10  ;;  %s1003_s30 = scalar_lea.hbm %s1502_s2, 2048 }
  0x5a   : > { %850 = dma.hbm_to_vmem [thread:$0]  (!%p1528_p13), %s1326_s14, 64, %s206_s13, %s194_s6  }
  0x5b   : > { %p1001_p1 = pnand %p999_p7, %p1279_p2  ;;  %p1004_p0 = scmp.lt.u32.totalorder %s1311_s26, %s1502_s2 }
  0x5c   : > { %p1005_p11 = scmp.lt.u32.totalorder %s1003_s30, %s998_s10  ;;  %p1007_p6 = scmp.lt.u32.totalorder %s998_s10, %s1311_s26 }
  0x5d   : > { %p1002_p3 = pneg %p1001_p1 }
  0x5e   : > { %p1006_p5 = por %p1005_p11, %p1004_p0 }
  0x60   : > { %p1008_p8 = por %p1007_p6, %p1006_p5 }
  0x62   : > { %p1009_p9 = pnand %p1008_p8, %p1002_p3 }
  0x64   : > { %1012 = shalt.err (!%p1009_p9)
}
  0x65   : > { %s1013_s14 = scalar_lea.vmem %s1328_s1, 1024  ;;  %s1152_s13 = smov [#allocation7]  }
  0x66   : > { %p1014_p12 = scmp.ne.s32.totalorder %s1328_s1, %s1013_s14  ;;  %s1018_s6 = sshll.u32 %s1152_s13, 4  ;;  %s1019_s6 = int_to_ptr.vmem [resolvable:$false] %s1018_s6 }
  0x67   : > { %s1020_s5 = scalar_lea.vmem %s1019_s6, 2048  ;;  %p1021_p7 = scmp.lt.s32.totalorder %s1328_s1, %s1019_s6 }
  0x68   : > { %p1016_p4 = pnand %p1014_p12, %p1279_p2  ;;  %p1022_p1 = scmp.lt.s32.totalorder %s1020_s5, %s1013_s14 }
  0x6a   : > { %p1017_p10 = pneg %p1016_p4  ;;  %p1023_p0 = por %p1022_p1, %p1021_p7 }
  0x6c   : > { %p1024_p11 = pnand %p1023_p0, %p1017_p10 }
  0x6e   : > { %1027 = shalt.err (!%p1024_p11)
}
  0x6f   : > { %s1529_s9 = smov 64   ;;  %p1530_p2 = scmp.ne.s32.totalorder %s1527_s23, 0 }
  0x70   : > { %856 = dma.hbm_to_vmem [thread:$0]  (!%p1528_p13), %s1311_s26, 1024, %s1328_s1, %s1273_s22, %s1529_s9, %s1529_s9, %s1150_s11  }
  0x71   : > { %256 = sbr.rel (%p1530_p2) target bundleno = 944 (0x3b0), region = 32  ;;  %s1376_s25 = sand.u32 (!%p1530_p2), 1, %s1130_s16  }
  0x72   : > { %s750_s24 = sshll.u32 (!%p1530_p2), %s1376_s25, 2  ;;  %s259_s10 = scalar_lea.sflag (!%p1530_p2), [#allocation3], %s1376_s25 }
  0x73   : > { %s1380_s7 = scalar_lea.vmem (!%p1530_p2), [#allocation2], %s750_s24  ;;  %p1531_p3 = scmp.ne.s32.totalorder (!%p1530_p2), %s1518_s27, 0 }
  0x78   : > { %1109 = dma.done.wait (%p1531_p3), %s259_s10, 64  }
  0x79   : > { %1111 = vsyncadd (%p1531_p3), %s259_s10, 4294967232  ;;  %s267_s1 = sand.u32 1, %s1213_s21   ;;  %s751_s23 = sshll.u32 %s1376_s25, 6 }
  0x7a   : > { %s268_s8 = scalar_lea.sflag [#allocation6], %s267_s1  ;;  %s271_s22 = scalar_lea.vmem [#allocation5], %s751_s23 }
  0x7b   : > { %1113 = dma.done.wait (%p1531_p3), %s268_s8, 2048  }
  0x7c   : > { %1115 = vsyncadd (%p1531_p3), %s268_s8, 4294965248  ;;  %v1153_v0 = vmov 0.0   ;;  %vm1154_vm0 = vmmov 0   ;;  %v918_v1 = vld [vmem:[%s271_s22] sm:$0xff]   ;;  %v919_v2 = vld [vmem:[%s271_s22 + $0x8] sm:$0xff]   ;;  %v442_v10 = vlaneseq  ;;  %s280_s21 = scalar_lea.vmem [#allocation7], %s751_s23 }
  0x7d   : > { %797 = vmatprep.subr.bf16.mxu0 %v1153_v0  ;;  %813 = vmatprep.mubr.msk.bf16.mxu0 %vm1154_vm0, %v1153_v0  ;;  %v920_v3 = vld [vmem:[%s271_s22 + $0x10] sm:$0xff]   ;;  %v921_v4 = vld [vmem:[%s271_s22 + $0x18] sm:$0xff]   ;;  %v922_v5 = vld [vmem:[%s271_s22 + $0x20] sm:$0xff]   ;;  %s753_s27 = sshll.u32 %s1376_s25, 3  ;;  %s773_s26 = sshll.u32 %s1138_s18, 7 }
  0x7e   : > { %817 = vmatprep.subr.bf16.mxu1 %v1153_v0  ;;  %833 = vmatprep.mubr.msk.bf16.mxu1 %vm1154_vm0, %v1153_v0  ;;  %v923_v6 = vld [vmem:[%s271_s22 + $0x28] sm:$0xff]   ;;  %v924_v7 = vld [vmem:[%s271_s22 + $0x30] sm:$0xff]   ;;  %v925_v8 = vld [vmem:[%s271_s22 + $0x38] sm:$0xff]   ;;  %v443_v11 = vand.u32 127, %v442_v10  ;;  %s319_s11 = scalar_lea.vmem [#allocation9], %s753_s27  ;;  %s1424_s12 = scalar_lea.hbm %s1504_s4, %s773_s26 }
  0x7f   : > { %798 = vmatpush3.bf16.xpose.msra.mxu0 %v918_v1  ;;  %v321_v9 = vld [vmem:[%s1380_s7] sm:$0xf]  ;;  %v926_v17 = vld [vmem:[%s280_s21] sm:$0xff]   ;;  %v927_v18 = vld [vmem:[%s280_s21 + $0x8] sm:$0xff]   ;;  %s581_s29 = sshll.u32 %s319_s11, 4  ;;  %s553_s14 = scalar_lea.sflag [#allocation10], %s1376_s25  ;;  %s582_s29 = int_to_ptr.vmem [resolvable:$true] %s581_s29 }
  0x80   : > { %799 = vmatprep.subr.bf16.mxu0 %v1153_v0  ;;  %vm444_vm1 = vcmp.lt.s32.totalorder %v443_v11, 16  ;;  %818 = vmatpush3.bf16.msra.mxu1 %v926_v17  ;;  %v928_v19 = vld [vmem:[%s280_s21 + $0x10] sm:$0xff]   ;;  %v929_v20 = vld [vmem:[%s280_s21 + $0x18] sm:$0xff]   ;;  %v930_v25 = vld [vmem:[%s280_s21 + $0x20] sm:$0xff]   ;;  %s1028_s13 = scalar_lea.vmem %s582_s29, 128  ;;  %p1532_p5 = scmp.ne.s32.totalorder %s1519_s28, 0 }
  0x81   : > { %819 = vmatprep.subr.bf16.mxu1 %v1153_v0  ;;  %v931_v26 = vld [vmem:[%s280_s21 + $0x28] sm:$0xff]   ;;  %v932_v27 = vld [vmem:[%s280_s21 + $0x30] sm:$0xff]   ;;  %v933_v28 = vld [vmem:[%s280_s21 + $0x38] sm:$0xff]   ;;  %p1029_p13 = scmp.ne.s32.totalorder %s582_s29, %s1028_s13  ;;  %s1155_s6 = smov [#allocation9]  }
  0x82   : > { %s1032_s5 = sshll.u32 %s1155_s6, 4  ;;  %s1033_s5 = int_to_ptr.vmem [resolvable:$false] %s1032_s5 }
  0x83   : > { %p1030_p6 = pnand %p1029_p13, %p1532_p5  ;;  %s1034_s9 = scalar_lea.vmem %s1033_s5, 256 }
  0x84   : > { %820 = vmatpush3.bf16.msra.mxu1 %v927_v18  ;;  %p1035_p9 = scmp.lt.s32.totalorder %s582_s29, %s1033_s5  ;;  %p1036_p12 = scmp.lt.s32.totalorder %s1034_s9, %s1028_s13 }
  0x85   : > { %821 = vmatprep.subr.bf16.mxu1 %v1153_v0  ;;  %p1031_p8 = pneg %p1030_p6 }
  0x86   : > { %p1037_p4 = por %p1036_p12, %p1035_p9 }
  0x87   : > { %800 = vmatpush3.bf16.xpose.msra.mxu0 %v919_v2 }
  0x88   : > { %801 = vmatprep.subr.bf16.mxu0 %v1153_v0  ;;  %822 = vmatpush3.bf16.msra.mxu1 %v928_v19  ;;  %p1038_p10 = pnand %p1037_p4, %p1031_p8 }
  0x89   : > { %823 = vmatprep.subr.bf16.mxu1 %v1153_v0 }
  0x8c   : > { %824 = vmatpush3.bf16.msra.mxu1 %v929_v20 }
  0x8d   : > { %825 = vmatprep.subr.bf16.mxu1 %v1153_v0 }
  0x8f   : > { %802 = vmatpush3.bf16.xpose.msra.mxu0 %v920_v3 }
  0x90   : > { %803 = vmatprep.subr.bf16.mxu0 %v1153_v0  ;;  %826 = vmatpush3.bf16.msra.mxu1 %v930_v25 }
  0x91   : > { %827 = vmatprep.subr.bf16.mxu1 %v1153_v0 }
  0x94   : > { %828 = vmatpush3.bf16.msra.mxu1 %v931_v26 }
  0x95   : > { %829 = vmatprep.subr.bf16.mxu1 %v1153_v0 }
  0x97   : > { %804 = vmatpush3.bf16.xpose.msra.mxu0 %v921_v4 }
  0x98   : > { %805 = vmatprep.subr.bf16.mxu0 %v1153_v0  ;;  %830 = vmatpush3.bf16.msra.mxu1 %v932_v27 }
  0x99   : > { %831 = vmatprep.subr.bf16.mxu1 %v1153_v0 }
  0x9c   : > { %832 = vmatpush3.bf16.msra.mxu1 %v933_v28 }
  0x9f   : > { %806 = vmatpush3.bf16.xpose.msra.mxu0 %v922_v5 }
  0xa0   : > { %807 = vmatprep.subr.bf16.mxu0 %v1153_v0 }
  0xa7   : > { %808 = vmatpush3.bf16.xpose.msra.mxu0 %v923_v6 }
  0xa8   : > { %809 = vmatprep.subr.bf16.mxu0 %v1153_v0 }
  0xaf   : > { %810 = vmatpush3.bf16.xpose.msra.mxu0 %v924_v7 }
  0xb0   : > { %811 = vmatprep.subr.bf16.mxu0 %v1153_v0 }
  0xb7   : > { %812 = vmatpush3.bf16.xpose.msra.mxu0 %v925_v8 }
  0xbe   : > { %814 = vmatmul.mubr.bf16.vlgmr.msra.gmra.mrb[0].mxu0 %v321_v9 }
 0x191   : > { %v436_v12 = vpop.f32.mrb[0].mxu0 }
 0x192   : > { %v815_v13 = vpop.f32.mrb[1].mxu0  ;;  %v445_v14 = vsel %vm444_vm1, %v436_v12, -1e+30 }
 0x193   : > { %446 = vmax.xlane.f32.xlu0 %v445_v14  ;;  %v439_v15 = vpop.f32.mrb[2].mxu0 }
 0x194   : > { %v816_v16 = vpop.f32.mrb[3].mxu0 }
 0x220   : > { %v447_v21 = vpop.xlane.xlu0 %446 }
 0x221   : > { %v448_v22 = vsub.f32 %v445_v14, %v447_v21 }
 0x223   : > { %v449_v23 = vmul.f32 1.442695, %v448_v22 }
 0x225   : > { %934 = vpow2.f32 %v449_v23 }
 0x22f   : > { %v935_v24 = vpop.eup %934 }
 0x230   : > { %451 = vadd.xlane.f32.xlu0 %v935_v24 }
 0x2bd   : > { %v452_v29 = vpop.xlane.xlu0 %451 }
 0x2be   : > { %936 = vrcp.f32 %v452_v29 }
 0x2c8   : > { %v937_v30 = vpop.eup %936 }
 0x2c9   : > { %v455_v31 = vmul.f32 %v937_v30, %v935_v24 }
 0x2cb   : > { %v457_v32 = vpack.c.bf16 %v455_v31, %v455_v31  ;;  %456 = vst [vmem:[%s319_s11] sm:$0xff] %v455_v31 }
 0x2cd   : > { %834 = vmatmul.mubr.bf16.vlgmr.msra.gmra.mrb[0].mxu1 %v457_v32 }
 0x2ce   : > { %1041 = shalt.err (!%p1038_p10)
}
 0x2cf   : > { %s1042_s24 = scalar_lea.hbm %s1424_s12, 128  ;;  %s1046_s1 = scalar_lea.hbm %s1504_s4, 256 }
 0x2d0   : > { %p1043_p7 = scmp.ne.s32.totalorder %s1424_s12, %s1042_s24  ;;  %p1047_p11 = scmp.lt.u32.totalorder %s1424_s12, %s1504_s4 }
 0x2d1   : > { %p1048_p2 = scmp.lt.u32.totalorder %s1046_s1, %s1042_s24  ;;  %p1050_p13 = scmp.lt.u32.totalorder %s1042_s24, %s1424_s12 }
 0x2d2   : > { %p1044_p1 = pnand %p1043_p7, %p1532_p5 }
 0x2d3   : > { %p1049_p3 = por %p1048_p2, %p1047_p11 }
 0x2d4   : > { %p1045_p0 = pneg %p1044_p1 }
 0x2d5   : > { %p1051_p6 = por %p1050_p13, %p1049_p3 }
 0x2d7   : > { %p1052_p8 = pnand %p1051_p6, %p1045_p0 }
 0x2d9   : > { %1055 = shalt.err (!%p1052_p8)
}
 0x2da   : > { %844 = dma.vmem_to_hbm [thread:$0]  (%p1532_p5), %s582_s29, 128, %s1424_s12, %s553_s14  }
 0x2db   : > { %s312_s22 = scalar_lea.vmem [#allocation8], %s753_s27  ;;  %s1453_s30 = scalar_lea.hbm %s1503_s3, %s773_s26 }
 0x2dc   : > { %s567_s21 = sshll.u32 %s312_s22, 4  ;;  %s548_s13 = scalar_lea.sflag [#allocation4], %s1376_s25  ;;  %s1446_s21 = int_to_ptr.vmem [resolvable:$true] %s567_s21 }
 0x2dd   : > { %s1056_s12 = scalar_lea.vmem %s1446_s21, 128  ;;  %s1156_s27 = smov [#allocation8]  }
 0x2de   : > { %p1057_p9 = scmp.ne.s32.totalorder %s1446_s21, %s1056_s12  ;;  %s1060_s18 = sshll.u32 %s1156_s27, 4  ;;  %s1061_s18 = int_to_ptr.vmem [resolvable:$false] %s1060_s18 }
 0x2df   : > { %s1062_s29 = scalar_lea.vmem %s1061_s18, 256  ;;  %p1063_p10 = scmp.lt.s32.totalorder %s1446_s21, %s1061_s18 }
 0x2e0   : > { %p1058_p12 = pnand %p1057_p9, %p1532_p5  ;;  %p1064_p7 = scmp.lt.s32.totalorder %s1062_s29, %s1056_s12 }
 0x2e2   : > { %p1059_p4 = pneg %p1058_p12  ;;  %p1065_p1 = por %p1064_p7, %p1063_p10 }
 0x2e4   : > { %p1066_p0 = pnand %p1065_p1, %p1059_p4 }
 0x3a0   : > { %v540_v33 = vpop.f32.mrb[0].mxu1 }
 0x3a1   : > { %546 = vst [vmem:[%s312_s22] sm:$0xff] %v540_v33  ;;  %v835_v34 = vpop.f32.mrb[1].mxu1 }
 0x3a2   : > { %v543_v35 = vpop.f32.mrb[2].mxu1 }
 0x3a3   : > { %1069 = shalt.err (!%p1066_p0)
}
 0x3a4   : > { %s1070_s25 = scalar_lea.hbm %s1453_s30, 128  ;;  %s1074_s6 = scalar_lea.hbm %s1503_s3, 256 }
 0x3a5   : > { %p1071_p11 = scmp.ne.s32.totalorder %s1453_s30, %s1070_s25  ;;  %p1075_p13 = scmp.lt.u32.totalorder %s1453_s30, %s1503_s3 }
 0x3a6   : > { %p1076_p6 = scmp.lt.u32.totalorder %s1074_s6, %s1070_s25  ;;  %p1078_p9 = scmp.lt.u32.totalorder %s1070_s25, %s1453_s30 }
 0x3a7   : > { %p1072_p2 = pnand %p1071_p11, %p1532_p5 }
 0x3a8   : > { %p1077_p8 = por %p1076_p6, %p1075_p13 }
 0x3a9   : > { %p1073_p3 = pneg %p1072_p2 }
 0x3aa   : > { %p1079_p12 = por %p1078_p9, %p1077_p8 }
 0x3ac   : > { %p1080_p4 = pnand %p1079_p12, %p1073_p3 }
 0x3ae   : > { %1083 = shalt.err (!%p1080_p4)
}
 0x3af   : > { %843 = dma.vmem_to_hbm [thread:$0]  (%p1532_p5), %s1446_s21, 128, %s1453_s30, %s548_s13   ;;  %v836_v36 = vpop.f32.mrb[3].mxu1 }
 0x3b0 PF: > { %s1533_s24 = sld [smem:[#allocation18_spill]]  ;;  %s593_s10 = sand.u32 1, %s1126_s15  }
 0x3b1   : > { %p1535_p7 = scmp.ge.s32.totalorder %s1146_s20, 2  ;;  %s594_s7 = scalar_lea.sflag [#allocation4], %s593_s10 }
 0x3b6   : > { %p1534_p10 = scmp.ne.s32.totalorder %s1533_s24, 0 }
 0x3b8   : > { %p858_p1 = pnand %p1535_p7, %p1534_p10 }
 0x3ba   : > { %1117 = dma.done.wait (!%p858_p1), %s594_s7, 128  }
 0x3bb   : > { %1119 = vsyncadd (!%p858_p1), %s594_s7, 4294967168  ;;  %s603_s1 = scalar_lea.sflag [#allocation10], %s593_s10 }
 0x3bc   : > { %1121 = dma.done.wait (!%p858_p1), %s603_s1, 128  }
 0x3bd   : > { %1123 = vsyncadd (!%p858_p1), %s603_s1, 4294967168  ;;  %s27_s20 = sadd.s32 1, %s1146_s20   ;;  %s1536_s28 = sld [smem:[#allocation15_spill]] }
 0x3be   : > { %p24_p0 = scmp.ge.s32.totalorder %s27_s20, 4   ;;  %s1537_s17 = sld [smem:[#allocation17_spill]] }
 0x3bf   : > { %s1538_s23 = sld [smem:[#allocation16_spill]]  ;;  %s1539_s15 = smov %s1130_s16 }
 0x3c0   : > { %s1541_s18 = smov %s1142_s19  ;;  %26 = sbr.rel (!%p24_p0) target bundleno = 12 (0xc), region = 118 }
 0x3c3   : > { %s1540_s16 = smov %s1536_s28 }
 0x3c5   : > { %s1542_s19 = smov %s1538_s23 }
 0x3c7   :  { %608 = vsyncpa [#allocation3], 1 }
 0x3c8   :  { %610 = vsyncpa [#allocation3 + $0x1], 1 }
 0x3c9   :  { %611 = vsyncpa [#allocation6], 1 }
 0x3ca   :  { %613 = vsyncpa [#allocation6 + $0x1], 1 }
 0x3cb   :  { %614 = vsyncpa [#allocation4], 1 }
 0x3cc   :  { %616 = vsyncpa [#allocation4 + $0x1], 1 }
 0x3cd   :  { %617 = vsyncpa [#allocation10], 1 }
 0x3ce   :  { %619 = vsyncpa [#allocation10 + $0x1], 1 }

</bundles_post_ra>
